<compile_context>
chip_gen: v7x
topology: tpu7x:2x2x1
jax: 0.10.0
libtpu: 0.0.40
codegen_flags: <defaults>
</compile_context>

<pallas_src>
import jax
import jax.numpy as jnp
from jax import lax
from jax.experimental import pallas as pl
from jax.experimental.pallas import tpu as pltpu


# ---------------------------------------------------------------------------
# Parameter init (deterministic, PyTorch-default-style uniform(-1/sqrt(fan_in)))
# ---------------------------------------------------------------------------
def _uniform(key, shape, bound):
    return jax.random.uniform(key, shape, jnp.float32, -bound, bound)


def init_params(key, features, T, action_dim):
    h0, h2, h1 = 8, 64, 64
    stride_time = T - 1 - 2
    ks = jax.random.split(key, 8)
    b0_bound = (features * 3 * 3) ** -0.5
    b1_bound = (h0 * 3 * 1) ** -0.5
    b2_bound = (h2 * stride_time * 1) ** -0.5
    b3_bound = (h1 * action_dim) ** -0.5
    W0 = _uniform(ks[0], (h0, features, 3, 3), b0_bound)
    b0 = _uniform(ks[1], (h0,), b0_bound)
    W1 = _uniform(ks[2], (h2, h0, 3, 1), b1_bound)
    b1 = _uniform(ks[3], (h2,), b1_bound)
    W2 = _uniform(ks[4], (h1, h2, stride_time, 1), b2_bound)
    b2 = _uniform(ks[5], (h1,), b2_bound)
    W3 = _uniform(ks[6], (action_dim, h1 * action_dim), b3_bound)
    b3 = _uniform(ks[7], (action_dim,), b3_bound)
    return W0, b0, W1, b1, W2, b2, W3, b3


# ---------------------------------------------------------------------------
# Pallas implementation
# ---------------------------------------------------------------------------
def torch_cnn_forward_pallas(x, params):
    """x: (B, features, T, action_dim) float32, NCHW (PyTorch convention)."""
    W0, b0, W1, b1, W2, b2, W3, b3 = params
    B, F, T, A = x.shape
    H = T - 1                    # height after dropping first time step
    ST = T - 3                   # conv2 kernel height == conv1 output height
    h0 = W0.shape[0]             # 8
    c1 = W1.shape[0]             # 64
    c2 = W2.shape[0]             # 64
    K0 = 9 * F                   # conv0 im2col K
    R0 = H * A                   # conv0 output rows per batch element
    R1 = (H - 2) * A             # conv1 output rows per batch element

    # ---- wrapper glue: slice time, NCHW -> NHWC, pad, im2col for conv0 ----
    xs = jnp.transpose(x[:, :, 1:, :], (0, 2, 3, 1))            # (B, H, A, F)
    xpad = jnp.pad(xs, ((0, 0), (1, 1), (1, 1), (0, 0)))        # (B, H+2, A+2, F)
    cols = [xpad[:, kh:kh + H, kw:kw + A, :]
            for kh in range(3) for kw in range(3)]
    x0 = jnp.concatenate(cols, axis=-1).reshape(B, R0, K0)      # rows = (h, w)

    # ---- repack weights: taps stacked along K, channels on lanes ----
    w0_k = jnp.transpose(W0, (2, 3, 1, 0)).reshape(K0, h0)               # [(kh,kw,ic), oc]
    w1_k = jnp.transpose(W1[:, :, :, 0], (2, 1, 0)).reshape(3 * h0, c1)  # [(kh,ic), oc]
    w2_k = jnp.transpose(W2[:, :, :, 0], (2, 1, 0)).reshape(ST * c1, c2) # [(kh,ic), oc]
    # PyTorch flattens phi2 (B, c2, 1, A) channel-major (idx = c*A + w); our
    # in-kernel flatten is (w, c) row-major, so permute W3 to (w*c2 + c, out).
    w3_k = jnp.transpose(W3.reshape(A, c2, A), (2, 1, 0)).reshape(A * c2, A)
    b0_k = b0.reshape(1, h0)
    b1_k = b1.reshape(1, c1)
    b2_k = b2.reshape(1, c2)
    b3_k = b3.reshape(1, A)

    def kernel(x_ref, w0_ref, b0_ref, w1_ref, b1_ref, w2_ref, b2_ref,
               w3_ref, b3_ref, out_ref):
        # NOTE: the PyTorch forward computes w0 = x[:, :1, :1, :] but never
        # uses it, so it is intentionally omitted here.
        # --- conv0: one matmul (im2col built in the wrapper) ---
        phi0 = jnp.maximum(
            jnp.dot(x_ref[0], w0_ref[...], preferred_element_type=jnp.float32)
            + b0_ref[...], 0.0)                                    # (R0, h0)
        # --- conv1: 3 height taps folded into K -> one (R1, 3*h0)x(3*h0, c1) dot ---
        x1 = jnp.concatenate(
            [phi0[kh * A:kh * A + R1, :] for kh in range(3)], axis=-1)
        phi1 = jnp.maximum(
            jnp.dot(x1, w1_ref[...], preferred_element_type=jnp.float32)
            + b1_ref[...], 0.0)                                    # (R1, c1)
        # --- conv2: kernel height == stride == remaining height -> one output
        #     row; ST taps folded into K -> one (A, ST*c1)x(ST*c1, c2) dot ---
        x2 = jnp.concatenate(
            [phi1[kh * A:(kh + 1) * A, :] for kh in range(ST)], axis=-1)
        phi2 = jnp.maximum(
            jnp.dot(x2, w2_ref[...], preferred_element_type=jnp.float32)
            + b2_ref[...], 0.0)                                    # (A, c2)
        # --- linear: single (1, A*c2) x (A*c2, A) dot + softmax ---
        flat = jnp.concatenate([phi2[w:w + 1, :] for w in range(A)], axis=-1)
        logits = (jnp.dot(flat, w3_ref[...], preferred_element_type=jnp.float32)
                  + b3_ref[...])                                   # (1, A)
        m = jnp.max(logits, axis=-1, keepdims=True)
        e = jnp.exp(logits - m)
        out_ref[0] = e / jnp.sum(e, axis=-1, keepdims=True)

    flops = 2 * B * (R0 * K0 * h0 + R1 * (3 * h0) * c1
                     + A * (ST * c1) * c2 + (A * c2) * A)
    bytes_accessed = 4 * (x0.size + w0_k.size + w1_k.size + w2_k.size
                          + w3_k.size + b0_k.size + b1_k.size + b2_k.size
                          + b3_k.size + B * A)
    cost = pl.CostEstimate(flops=flops, transcendentals=B * A,
                           bytes_accessed=bytes_accessed)

    def full_spec(arr):
        nd = arr.ndim
        return pl.BlockSpec(arr.shape, lambda b, _nd=nd: (0,) * _nd)

    out = pl.pallas_call(
        kernel,
        out_shape=jax.ShapeDtypeStruct((B, 1, A), jnp.float32),
        grid_spec=pltpu.PrefetchScalarGridSpec(
            num_scalar_prefetch=0,
            grid=(B,),
            in_specs=[
                pl.BlockSpec((1, R0, K0), lambda b: (b, 0, 0)),   # per-batch im2col
                full_spec(w0_k), full_spec(b0_k),
                full_spec(w1_k), full_spec(b1_k),
                full_spec(w2_k), full_spec(b2_k),
                full_spec(w3_k), full_spec(b3_k),
            ],
            out_specs=pl.BlockSpec((1, 1, A), lambda b: (b, 0, 0)),
        ),
        compiler_params=pltpu.CompilerParams(
            dimension_semantics=("parallel",)),
        cost_estimate=cost,
    )(x0, w0_k, b0_k, w1_k, b1_k, w2_k, b2_k, w3_k, b3_k)
    return out.reshape(B, A)


# ---------------------------------------------------------------------------
# Pure-JAX reference (mirrors the PyTorch forward exactly)
# ---------------------------------------------------------------------------
def reference_forward(x, params):
    W0, b0, W1, b1, W2, b2, W3, b3 = params
    dn = ("NCHW", "OIHW", "NCHW")
    xs = x[:, :, 1:, :]
    p0 = lax.conv_general_dilated(xs, W0, (1, 1), ((1, 1), (1, 1)),
                                  dimension_numbers=dn,
                                  precision=lax.Precision.HIGHEST)
    p0 = jax.nn.relu(p0 + b0[None, :, None, None])
    p1 = lax.conv_general_dilated(p0, W1, (1, 1), "VALID",
                                  dimension_numbers=dn,
                                  precision=lax.Precision.HIGHEST)
    p1 = jax.nn.relu(p1 + b1[None, :, None, None])
    st = p1.shape[2]
    p2 = lax.conv_general_dilated(p1, W2, (st, 1), "VALID",
                                  dimension_numbers=dn,
                                  precision=lax.Precision.HIGHEST)
    p2 = jax.nn.relu(p2 + b2[None, :, None, None])
    flat = p2.reshape(p2.shape[0], -1)
    logits = flat @ W3.T + b3
    return jax.nn.softmax(logits, axis=1)


if __name__ == "__main__":
    # state_dim = (features=4, T=8, action_dim=4), action_dim = 4, batch = 2
    # TODO(synk): batch_norm=True branch (nn.BatchNorm2d) not implemented;
    # the module is exercised with batch_norm=False.
    B, F, T, A = 2, 4, 8, 4

    key = jax.random.PRNGKey(0)
    params = init_params(key, F, T, A)
    x = jax.random.normal(jax.random.fold_in(key, 123), (B, F, T, A), jnp.float32)

    out = torch_cnn_forward_pallas(x, params)
    out = jax.block_until_ready(out)

    ref = reference_forward(x, params)
    assert out.shape == (B, A), (out.shape, (B, A))
    assert bool(jnp.allclose(out, ref, atol=1e-4, rtol=1e-4)), (
        "Pallas kernel output does not match reference")
    print("KERNEL_OK")
</pallas_src>

<mosaic_0001>
module attributes {stable_mosaic.version = 11 : i64} {
  func.func @kernel(%arg0: i32, %arg1: memref<1x28x36xf32, #tpu.memory_space<vmem>>, %arg2: memref<36x8xf32, #tpu.memory_space<vmem>>, %arg3: memref<1x8xf32, #tpu.memory_space<vmem>>, %arg4: memref<24x64xf32, #tpu.memory_space<vmem>>, %arg5: memref<1x64xf32, #tpu.memory_space<vmem>>, %arg6: memref<320x64xf32, #tpu.memory_space<vmem>>, %arg7: memref<1x64xf32, #tpu.memory_space<vmem>>, %arg8: memref<256x4xf32, #tpu.memory_space<vmem>>, %arg9: memref<1x4xf32, #tpu.memory_space<vmem>>, %arg10: memref<1x1x4xf32, #tpu.memory_space<vmem>>) attributes {dimension_semantics = [#tpu.dimension_semantics<parallel>], iteration_bounds = array<i64: 2>, scalar_prefetch = 0 : i64, scratch_operands = 0 : i64, tpu.core_type = #tpu.core_type<tc>, window_params = [{transform_indices = @transform_0, window_bounds = array<i64: 1, 28, 36>}, {pipeline_mode = #tpu.pipeline_mode<synchronous>, transform_indices = @transform_1, window_bounds = array<i64: 36, 8>}, {pipeline_mode = #tpu.pipeline_mode<synchronous>, transform_indices = @transform_2, window_bounds = array<i64: 1, 8>}, {pipeline_mode = #tpu.pipeline_mode<synchronous>, transform_indices = @transform_3, window_bounds = array<i64: 24, 64>}, {pipeline_mode = #tpu.pipeline_mode<synchronous>, transform_indices = @transform_4, window_bounds = array<i64: 1, 64>}, {pipeline_mode = #tpu.pipeline_mode<synchronous>, transform_indices = @transform_5, window_bounds = array<i64: 320, 64>}, {pipeline_mode = #tpu.pipeline_mode<synchronous>, transform_indices = @transform_6, window_bounds = array<i64: 1, 64>}, {pipeline_mode = #tpu.pipeline_mode<synchronous>, transform_indices = @transform_7, window_bounds = array<i64: 256, 4>}, {pipeline_mode = #tpu.pipeline_mode<synchronous>, transform_indices = @transform_8, window_bounds = array<i64: 1, 4>}, {transform_indices = @transform_9, window_bounds = array<i64: 1, 1, 4>}]} {
    %c0 = arith.constant 0 : index
    %c0_0 = arith.constant 0 : index
    %c0_1 = arith.constant 0 : index
    %0 = vector.load %arg1[%c0, %c0_0, %c0_1] : memref<1x28x36xf32, #tpu.memory_space<vmem>>, vector<1x28x36xf32>
    %1 = vector.shape_cast %0 : vector<1x28x36xf32> to vector<28x36xf32>
    %c0_2 = arith.constant 0 : index
    %c0_3 = arith.constant 0 : index
    %2 = vector.load %arg2[%c0_2, %c0_3] : memref<36x8xf32, #tpu.memory_space<vmem>>, vector<36x8xf32>
    %cst = arith.constant dense<0.000000e+00> : vector<28x8xf32>
    %3 = tpu.matmul %1, %2, %cst {dimension_numbers = #tpu.dot_dimension_numbers<[1], [0], [0], [1], [0, 0, 1, 1], [], []>} : vector<28x36xf32>, vector<36x8xf32>, vector<28x8xf32> -> vector<28x8xf32>
    %c0_4 = arith.constant 0 : index
    %c0_5 = arith.constant 0 : index
    %4 = vector.load %arg3[%c0_4, %c0_5] : memref<1x8xf32, #tpu.memory_space<vmem>>, vector<1x8xf32>
    %5 = vector.broadcast %4 : vector<1x8xf32> to vector<28x8xf32>
    %6 = arith.addf %3, %5 : vector<28x8xf32>
    %cst_6 = arith.constant 0.000000e+00 : f32
    %7 = vector.broadcast %cst_6 : f32 to vector<28x8xf32>
    %8 = arith.maximumf %6, %7 : vector<28x8xf32>
    %9 = vector.extract_strided_slice %8 {offsets = [0, 0], sizes = [20, 8], strides = [1, 1]} : vector<28x8xf32> to vector<20x8xf32>
    %10 = vector.extract_strided_slice %8 {offsets = [4, 0], sizes = [20, 8], strides = [1, 1]} : vector<28x8xf32> to vector<20x8xf32>
    %11 = vector.extract_strided_slice %8 {offsets = [8, 0], sizes = [20, 8], strides = [1, 1]} : vector<28x8xf32> to vector<20x8xf32>
    %12 = tpu.concatenate %9, %10, %11 in 1 : vector<20x8xf32>, vector<20x8xf32>, vector<20x8xf32> -> vector<20x24xf32>
    %c0_7 = arith.constant 0 : index
    %c0_8 = arith.constant 0 : index
    %13 = vector.load %arg4[%c0_7, %c0_8] : memref<24x64xf32, #tpu.memory_space<vmem>>, vector<24x64xf32>
    %cst_9 = arith.constant dense<0.000000e+00> : vector<20x64xf32>
    %14 = tpu.matmul %12, %13, %cst_9 {dimension_numbers = #tpu.dot_dimension_numbers<[1], [0], [0], [1], [0, 0, 1, 1], [], []>} : vector<20x24xf32>, vector<24x64xf32>, vector<20x64xf32> -> vector<20x64xf32>
    %c0_10 = arith.constant 0 : index
    %c0_11 = arith.constant 0 : index
    %15 = vector.load %arg5[%c0_10, %c0_11] : memref<1x64xf32, #tpu.memory_space<vmem>>, vector<1x64xf32>
    %16 = vector.broadcast %15 : vector<1x64xf32> to vector<20x64xf32>
    %17 = arith.addf %14, %16 : vector<20x64xf32>
    %cst_12 = arith.constant 0.000000e+00 : f32
    %18 = vector.broadcast %cst_12 : f32 to vector<20x64xf32>
    %19 = arith.maximumf %17, %18 : vector<20x64xf32>
    %20 = vector.extract_strided_slice %19 {offsets = [0, 0], sizes = [4, 64], strides = [1, 1]} : vector<20x64xf32> to vector<4x64xf32>
    %21 = vector.extract_strided_slice %19 {offsets = [4, 0], sizes = [4, 64], strides = [1, 1]} : vector<20x64xf32> to vector<4x64xf32>
    %22 = vector.extract_strided_slice %19 {offsets = [8, 0], sizes = [4, 64], strides = [1, 1]} : vector<20x64xf32> to vector<4x64xf32>
    %23 = vector.extract_strided_slice %19 {offsets = [12, 0], sizes = [4, 64], strides = [1, 1]} : vector<20x64xf32> to vector<4x64xf32>
    %24 = vector.extract_strided_slice %19 {offsets = [16, 0], sizes = [4, 64], strides = [1, 1]} : vector<20x64xf32> to vector<4x64xf32>
    %25 = tpu.concatenate %20, %21, %22, %23, %24 in 1 : vector<4x64xf32>, vector<4x64xf32>, vector<4x64xf32>, vector<4x64xf32>, vector<4x64xf32> -> vector<4x320xf32>
    %c0_13 = arith.constant 0 : index
    %c0_14 = arith.constant 0 : index
    %26 = vector.load %arg6[%c0_13, %c0_14] : memref<320x64xf32, #tpu.memory_space<vmem>>, vector<320x64xf32>
    %cst_15 = arith.constant dense<0.000000e+00> : vector<4x64xf32>
    %27 = tpu.matmul %25, %26, %cst_15 {dimension_numbers = #tpu.dot_dimension_numbers<[1], [0], [0], [1], [0, 0, 1, 1], [], []>} : vector<4x320xf32>, vector<320x64xf32>, vector<4x64xf32> -> vector<4x64xf32>
    %c0_16 = arith.constant 0 : index
    %c0_17 = arith.constant 0 : index
    %28 = vector.load %arg7[%c0_16, %c0_17] : memref<1x64xf32, #tpu.memory_space<vmem>>, vector<1x64xf32>
    %29 = vector.broadcast %28 : vector<1x64xf32> to vector<4x64xf32>
    %30 = arith.addf %27, %29 : vector<4x64xf32>
    %cst_18 = arith.constant 0.000000e+00 : f32
    %31 = vector.broadcast %cst_18 : f32 to vector<4x64xf32>
    %32 = arith.maximumf %30, %31 : vector<4x64xf32>
    %33 = vector.extract_strided_slice %32 {offsets = [0, 0], sizes = [1, 64], strides = [1, 1]} : vector<4x64xf32> to vector<1x64xf32>
    %34 = vector.extract_strided_slice %32 {offsets = [1, 0], sizes = [1, 64], strides = [1, 1]} : vector<4x64xf32> to vector<1x64xf32>
    %35 = vector.extract_strided_slice %32 {offsets = [2, 0], sizes = [1, 64], strides = [1, 1]} : vector<4x64xf32> to vector<1x64xf32>
    %36 = vector.extract_strided_slice %32 {offsets = [3, 0], sizes = [1, 64], strides = [1, 1]} : vector<4x64xf32> to vector<1x64xf32>
    %37 = tpu.concatenate %33, %34, %35, %36 in 1 : vector<1x64xf32>, vector<1x64xf32>, vector<1x64xf32>, vector<1x64xf32> -> vector<1x256xf32>
    %c0_19 = arith.constant 0 : index
    %c0_20 = arith.constant 0 : index
    %38 = vector.load %arg8[%c0_19, %c0_20] : memref<256x4xf32, #tpu.memory_space<vmem>>, vector<256x4xf32>
    %cst_21 = arith.constant dense<0.000000e+00> : vector<1x4xf32>
    %39 = tpu.matmul %37, %38, %cst_21 {dimension_numbers = #tpu.dot_dimension_numbers<[1], [0], [0], [1], [0, 0, 1, 1], [], []>} : vector<1x256xf32>, vector<256x4xf32>, vector<1x4xf32> -> vector<1x4xf32>
    %c0_22 = arith.constant 0 : index
    %c0_23 = arith.constant 0 : index
    %40 = vector.load %arg9[%c0_22, %c0_23] : memref<1x4xf32, #tpu.memory_space<vmem>>, vector<1x4xf32>
    %41 = arith.addf %39, %40 : vector<1x4xf32>
    %cst_24 = arith.constant dense<0xFF800000> : vector<1xf32>
    %42 = vector.multi_reduction <maximumf>, %41, %cst_24 [1] : vector<1x4xf32> to vector<1xf32>
    %43 = vector.shape_cast %42 : vector<1xf32> to vector<1x1xf32>
    %44 = vector.broadcast %43 : vector<1x1xf32> to vector<1x4xf32>
    %45 = arith.subf %41, %44 : vector<1x4xf32>
    %46 = math.exp %45 : vector<1x4xf32>
    %cst_25 = arith.constant dense<0.000000e+00> : vector<1xf32>
    %47 = vector.multi_reduction <add>, %46, %cst_25 [1] : vector<1x4xf32> to vector<1xf32>
    %48 = vector.shape_cast %47 : vector<1xf32> to vector<1x1xf32>
    %49 = vector.broadcast %48 : vector<1x1xf32> to vector<1x4xf32>
    %50 = arith.divf %46, %49 : vector<1x4xf32>
    %c0_26 = arith.constant 0 : index
    %c0_27 = arith.constant 0 : index
    %c0_28 = arith.constant 0 : index
    %51 = vector.load %arg10[%c0_26, %c0_27, %c0_28] : memref<1x1x4xf32, #tpu.memory_space<vmem>>, vector<1x1x4xf32>
    %52 = vector.shape_cast %51 : vector<1x1x4xf32> to vector<1x4xf32>
    %53 = vector.shape_cast %50 : vector<1x4xf32> to vector<1x1x4xf32>
    tpu.vector_store %arg10[%c0_26, %c0_27, %c0_28], %53 {strides = array<i32>} : memref<1x1x4xf32, #tpu.memory_space<vmem>>, vector<1x1x4xf32>,
    return
  }
  func.func @transform_0(%arg0: i32) -> (i32, i32, i32) {
    %c0_i32 = arith.constant 0 : i32
    %c0_i32_0 = arith.constant 0 : i32
    %c0_i32_1 = arith.constant 0 : i32
    return %arg0, %c0_i32, %c0_i32_0 : i32, i32, i32
  }
  func.func @transform_1(%arg0: i32) -> (i32, i32) {
    %c0_i32 = arith.constant 0 : i32
    %c0_i32_0 = arith.constant 0 : i32
    %c0_i32_1 = arith.constant 0 : i32
    return %c0_i32, %c0_i32_0 : i32, i32
  }
  func.func @transform_2(%arg0: i32) -> (i32, i32) {
    %c0_i32 = arith.constant 0 : i32
    %c0_i32_0 = arith.constant 0 : i32
    %c0_i32_1 = arith.constant 0 : i32
    return %c0_i32, %c0_i32_0 : i32, i32
  }
  func.func @transform_3(%arg0: i32) -> (i32, i32) {
    %c0_i32 = arith.constant 0 : i32
    %c0_i32_0 = arith.constant 0 : i32
    %c0_i32_1 = arith.constant 0 : i32
    return %c0_i32, %c0_i32_0 : i32, i32
  }
  func.func @transform_4(%arg0: i32) -> (i32, i32) {
    %c0_i32 = arith.constant 0 : i32
    %c0_i32_0 = arith.constant 0 : i32
    %c0_i32_1 = arith.constant 0 : i32
    return %c0_i32, %c0_i32_0 : i32, i32
  }
  func.func @transform_5(%arg0: i32) -> (i32, i32) {
    %c0_i32 = arith.constant 0 : i32
    %c0_i32_0 = arith.constant 0 : i32
    %c0_i32_1 = arith.constant 0 : i32
    return %c0_i32, %c0_i32_0 : i32, i32
  }
  func.func @transform_6(%arg0: i32) -> (i32, i32) {
    %c0_i32 = arith.constant 0 : i32
    %c0_i32_0 = arith.constant 0 : i32
    %c0_i32_1 = arith.constant 0 : i32
    return %c0_i32, %c0_i32_0 : i32, i32
  }
  func.func @transform_7(%arg0: i32) -> (i32, i32) {
    %c0_i32 = arith.constant 0 : i32
    %c0_i32_0 = arith.constant 0 : i32
    %c0_i32_1 = arith.constant 0 : i32
    return %c0_i32, %c0_i32_0 : i32, i32
  }
  func.func @transform_8(%arg0: i32) -> (i32, i32) {
    %c0_i32 = arith.constant 0 : i32
    %c0_i32_0 = arith.constant 0 : i32
    %c0_i32_1 = arith.constant 0 : i32
    return %c0_i32, %c0_i32_0 : i32, i32
  }
  func.func @transform_9(%arg0: i32) -> (i32, i32, i32) {
    %c0_i32 = arith.constant 0 : i32
    %c0_i32_0 = arith.constant 0 : i32
    %c0_i32_1 = arith.constant 0 : i32
    return %arg0, %c0_i32, %c0_i32_0 : i32, i32, i32
  }
}

</mosaic_0001>

<bundles_post_ra>
// kernel: tpu_custom_call.1
= control target key start
LH: loop header
LB: loop body
LE: loop exit
PB: predicated region body
PF: predicated region fallthrough
CT: control target
= control target key end

     0   :  { %14 = vsyncpa [#allocation3], 0  ;;  %s1808_s0 = inlined_call_operand.vmem [shape: f32[2,28,36], index: 0, kind: input, shape index: {}]   ;;  %s1809_s1 = inlined_call_operand.vmem [shape: f32[36,8], index: 1, kind: input, shape index: {}]   ;;  %s1810_s2 = inlined_call_operand.vmem [shape: f32[1,8], index: 2, kind: input, shape index: {}]   ;;  %s1811_s3 = inlined_call_operand.vmem [shape: f32[24,64], index: 3, kind: input, shape index: {}]   ;;  %s1812_s4 = inlined_call_operand.vmem [shape: f32[1,64], index: 4, kind: input, shape index: {}]   ;;  %s1813_s5 = inlined_call_operand.vmem [shape: f32[320,64], index: 5, kind: input, shape index: {}]   ;;  %s1814_s6 = inlined_call_operand.vmem [shape: f32[1,64], index: 6, kind: input, shape index: {}]   ;;  %s1815_s7 = inlined_call_operand.vmem [shape: f32[256,4], index: 7, kind: input, shape index: {}]   ;;  %s1816_s8 = inlined_call_operand.vmem [shape: f32[1,4], index: 8, kind: input, shape index: {}]   ;;  %s1817_s9 = inlined_call_operand.hbm [shape: f32[2,1,4], index: 9, kind: output, shape index: {}]  }
   0x1   :  { %16 = vsyncpa [#allocation3 + $0x1], 0  ;;  %s1424_s30 = smov 0   ;;  %s1426_s10 = smov 0  }
   0x2   :  { %s1428_s11 = smov 0   ;;  %s1430_s12 = smov 0  }
   0x3 LB: > { %s1445_s13 = sadd.s32 4294967295, %s1365_s12   ;;  %s991_s14 = sadd.s32 4294967294, %s1365_s12   ;;  %s1365_s12 = sphi %s1430_s12, %s1823_s12   ;;  %s1361_s11 = sphi %s1428_s11, %s1822_s11   ;;  %s1357_s10 = sphi %s1426_s10, %s1821_s10   ;;  %s1353_s30 = sphi %s1424_s30, %s1820_s30  }
   0x4   : > { %s1449_s15 = sadd.s32 1, %s1365_s12   ;;  %s223_s16 = sadd.s32 1, %s1361_s11 }
   0x5   : > { %s220_s17 = ssub.s32 %s1365_s12, %s1449_s15  ;;  %p233_p0 = scmp.ne.s32.totalorder %s1361_s11, %s1357_s10 }
   0x6   : > { %p221_p1 = scmp.eq.s32.totalorder %s220_s17, 0  ;;  %p234_p2 = scmp.eq.s32.totalorder %s1445_s13, 1 }
   0x7   : > { %p239_p3 = scmp.ne.s32.totalorder %s1357_s10, %s1353_s30  ;;  %p240_p4 = scmp.eq.s32.totalorder %s991_s14, 1 }
   0x8   : > { %s1460_s18 = scalar_select %p221_p1, %s1361_s11, %s223_s16  }
   0x9   : > { %p1462_p5 = por %p234_p2, %p233_p0  ;;  %p1466_p6 = por %p240_p4, %p239_p3 }
   0xa   : > { %p994_p7 = scmp.ge.s32.totalorder %s1365_s12, 1  ;;  %p290_p8 = scmp.lt.s32.totalorder %s1365_s12, 3 }
   0xc   : > { %p291_p9 = pnand %p994_p7, %p290_p8 }
   0xd   : > { %v334_v0 = vld [vmem:[%s1809_s1] sm:$0xff] (!%p291_p9)  ;;  %v335_v1 = vld [vmem:[%s1809_s1 + $0x8] sm:$0xff] (!%p291_p9)  ;;  %v336_v2 = vld [vmem:[%s1809_s1 + $0x10] sm:$0xff] (!%p291_p9)  ;;  %p325_p10 = scmp.lt.s32.totalorder (!%p291_p9), %s1445_s13, 1  ;;  %vm346_vm0 = vcmask (!%p291_p9), 293888   ;;  %vm359_vm1 = vcmask (!%p291_p9), 1043456  }
   0xe   : > { %294 = sbr.rel (%p291_p9) target bundleno = 1599 (0x63f), region = 56  ;;  %v1157_v3 = vpack.c.bf16 (!%p291_p9), %v335_v1, %v334_v0  ;;  %v337_v4 = vld [vmem:[%s1809_s1 + $0x18] sm:$0xff] (!%p291_p9)  ;;  %v338_v6 = vld [vmem:[%s1809_s1 + $0x20] sm:$0xf] (!%p291_p9)  ;;  %v488_v12 = vld [vmem:[%s1811_s3 + $0x8] sm:$0xff] (!%p291_p9)  ;;  %v1367_v13 = vmov (!%p291_p9), 0.0|0.0  }
   0xf   : > { %v1161_v5 = vpack.c.bf16 (!%p291_p9), %v337_v4, %v336_v2  ;;  %v487_v11 = vld [vmem:[%s1811_s3] sm:$0xff] (!%p291_p9)  ;;  %1200 = vmatprep.subr.bf16.mxu0 (!%p291_p9), %v1367_v13  ;;  %v489_v15 = vld [vmem:[%s1811_s3 + $0x10] sm:$0xff] (!%p291_p9)  ;;  %v1368_v16 = vmov (!%p291_p9), 0.0   ;;  %vm1369_vm2 = vmmov (!%p291_p9), 0   ;;  %s1370_s17 = smov (!%p291_p9), 8   ;;  %v636_v32 = vld [vmem:[%s1813_s5 + $0x108] sm:$0xff] (!%p291_p9) }
  0x10   : > { %1158 = vmatprep.subr.bf16.mxu1 (!%p291_p9), %v1157_v3  ;;  %v1166_v14 = vpack.c.bf16 (!%p291_p9), %v488_v12, %v487_v11  ;;  %v997_v17 = vld [vmem:[%s1810_s2] ss:$0 sm:$0xff] (!%p291_p9)  ;;  %1154 = vmatprep.mubr.msk.f32.mxu0 (!%p291_p9), %vm1369_vm2, %v1368_v16  ;;  %s1371_s25 = smov (!%p291_p9), 16   ;;  %vm479_vm3 = vcmask (!%p291_p9), 64512   ;;  %vm483_vm4 = vcmask (!%p291_p9), 130048   ;;  %vm497_vm5 = vcmask (!%p291_p9), 195584  }
  0x11   : > { %1160 = vmatpush3.bf16.msra.mxu1 (!%p291_p9), %v1157_v3  ;;  %v635_v31 = vld [vmem:[%s1813_s5 + $0x100] sm:$0xff] (!%p291_p9)  ;;  %v637_v50 = vld [vmem:[%s1813_s5 + $0x110] sm:$0xff] (!%p291_p9)  ;;  %v638_v51 = vld [vmem:[%s1813_s5 + $0x118] sm:$0xff] (!%p291_p9)  ;;  %vm600_vm6 = vcmask (!%p291_p9), 523264   ;;  %vm910_vm7 = vcmask (!%p291_p9), 24576   ;;  %s1009_s23 = sshll.u32 (!%p291_p9), %s1445_s13, 4 }
  0x12   : > { %1162 = vmatprep.subr.bf16.mxu1 (!%p291_p9), %v1161_v5  ;;  %v1201_v34 = vpack.c.bf16 (!%p291_p9), %v636_v32, %v635_v31  ;;  %v1204_v52 = vpack.c.bf16 (!%p291_p9), %v638_v51, %v637_v50  ;;  %v639_v53 = vld [vmem:[%s1813_s5 + $0x120] sm:$0xff] (!%p291_p9)  ;;  %v640_v54 = vld [vmem:[%s1813_s5 + $0x128] sm:$0xff] (!%p291_p9)  ;;  %v641_v56 = vld [vmem:[%s1813_s5 + $0x130] sm:$0xff] (!%p291_p9)  ;;  %s1765_s28 = scalar_lea.hbm (!%p291_p9), %s1817_s9, %s1009_s23 }
  0x13   : > { %v1207_v55 = vpack.c.bf16 (!%p291_p9), %v640_v54, %v639_v53  ;;  %v642_v57 = vld [vmem:[%s1813_s5 + $0x138] sm:$0xff] (!%p291_p9)  ;;  %v619_v59 = vld [vmem:[%s1813_s5 + $0x80] sm:$0xff] (!%p291_p9)  ;;  %v620_v60 = vld [vmem:[%s1813_s5 + $0x88] sm:$0xff] (!%p291_p9) }
  0x14   : > { %1202 = vmatpush3.bf16.msra.mxu0 (!%p291_p9), %v1201_v34  ;;  %v1210_v58 = vpack.c.bf16 (!%p291_p9), %v642_v57, %v641_v56  ;;  %v603_v61 = vld [vmem:[%s1813_s5] sm:$0xff] (!%p291_p9)  ;;  %v1168_v62 = vpack.c.bf16 (!%p291_p9), %v620_v60, %v619_v59  ;;  %v604_v63 = vld [vmem:[%s1813_s5 + $0x8] sm:$0xff] (!%p291_p9)  ;;  %v621_v0 = vld [vmem:[%s1813_s5 + $0x90] sm:$0xff] (!%p291_p9) }
  0x15   : > { %s326_s29 = scalar_select %p325_p10, %s1445_s13, 1  ;;  %1164 = vmatpush3.bf16.msra.mxu1 %v1161_v5  ;;  %1203 = vmatprep.subr.bf16.mxu0 %v1367_v13  ;;  %v622_v1 = vld [vmem:[%s1813_s5 + $0x98] sm:$0xff]  ;;  %v1170_v2 = vpack.c.bf16 %v604_v63, %v603_v61  ;;  %v605_v4 = vld [vmem:[%s1813_s5 + $0x10] sm:$0xff]  ;;  %v608_v11 = vld [vmem:[%s1813_s5 + $0x28] sm:$0xff] }
  0x16   : > { %1115 = vmatprep.subr.msk.mxu1 %vm359_vm1, %v338_v6  ;;  %v1172_v3 = vpack.c.bf16 %v622_v1, %v621_v0  ;;  %v606_v5 = vld [vmem:[%s1813_s5 + $0x18] sm:$0xff]  ;;  %v625_v12 = vld [vmem:[%s1813_s5 + $0xb0] sm:$0xff]  ;;  %v632_v31 = vld [vmem:[%s1813_s5 + $0xe8] sm:$0xff]  ;;  %s1373_s13 = smov [#allocation2]  }
  0x17   : > { %s1012_s14 = sshll.u32 %s326_s29, 5  ;;  %v615_v34 = vld [vmem:[%s1813_s5 + $0x60] sm:$0xff]  ;;  %s1307_s16 = sshll.u32 %s1373_s13, 4  ;;  %s1308_s16 = int_to_ptr.vmem [resolvable:$false] %s1307_s16 }
  0x18   : > { %s329_s21 = scalar_lea.vmem %s1808_s0, %s1012_s14  ;;  %1205 = vmatpush3.bf16.msra.mxu0 %v1204_v52 }
  0x19   : > { %v330_v7 = vld [vmem:[%s329_s21] sm:$0xff]  ;;  %v331_v8 = vld [vmem:[%s329_s21 + $0x8] sm:$0xff]  ;;  %v332_v9 = vld [vmem:[%s329_s21 + $0x10] sm:$0xff]  ;;  %1116 = vmatpush3.msk.msra.mxu1 %vm359_vm1, %v338_v6  ;;  %1206 = vmatprep.subr.bf16.mxu0 %v1367_v13 }
  0x1a   : > { %1117 = vmatprep.mubr.msk.f32.mxu1 %vm346_vm0, %v330_v7  ;;  %v333_v10 = vld [vmem:[%s329_s21 + $0x18] sm:$0xf]  ;;  %1165 = vmatprep.subr.bf16.mxu1 %v1367_v13  ;;  %v623_v6 = vld [vmem:[%s1813_s5 + $0xa0] sm:$0xff]  ;;  %v624_v7 = vld [vmem:[%s1813_s5 + $0xa8] sm:$0xff]  ;;  %s1309_s21 = scalar_lea.vmem %s1308_s16, 32 }
  0x1b   : > { %1118 = vmatmul.mubr.msk.f32.vlgmr.msra.gmra.mrb[0].mxu1 %vm346_vm0, %v331_v8  ;;  %v1174_v8 = vpack.c.bf16 %v606_v5, %v605_v4  ;;  %v807_v4 = vld [vmem:[%s1815_s7] sm:$0xff] }
  0x1c   : > { %1120 = vmatprep.mubr.msk.f32.mxu1 %vm346_vm0, %v332_v9  ;;  %1167 = vmatpush3.bf16.msra.mxu1 %v1166_v14  ;;  %v1176_v9 = vpack.c.bf16 %v624_v7, %v623_v6  ;;  %v808_v6 = vld [vmem:[%s1815_s7 + $0x8] sm:$0xff]  ;;  %v825_v7 = vld [vmem:[%s1815_s7 + $0x90] sm:$0xff] }
  0x1d   : > { %1127 = vmatprep.subr.mxu1 %v1368_v16  ;;  %1208 = vmatpush3.bf16.msra.mxu0 %v1207_v55 }
  0x1e   : > { %1209 = vmatprep.subr.bf16.mxu0 %v1367_v13  ;;  %v626_v13 = vld [vmem:[%s1813_s5 + $0xb8] sm:$0xff] }
  0x1f   : > { %1121 = vmatmul.mubr.msk.f32.gmra.mrb[2].mxu1 %vm346_vm0, %v333_v10  ;;  %v607_v10 = vld [vmem:[%s1813_s5 + $0x20] sm:$0xff] }
  0x20   : > { %1128 = vmatpush3.msra.mxu1 %v489_v15  ;;  %1129 = vmatprep.mubr.msk.f32.mxu1 %vm1369_vm2, %v1368_v16  ;;  %v1178_v14 = vpack.c.bf16 %v608_v11, %v607_v10  ;;  %v1180_v15 = vpack.c.bf16 %v626_v13, %v625_v12  ;;  %v809_v11 = vld [vmem:[%s1815_s7 + $0x10] sm:$0xff]  ;;  %v810_v12 = vld [vmem:[%s1815_s7 + $0x18] sm:$0xff]  ;;  %v827_v13 = vld [vmem:[%s1815_s7 + $0xa0] sm:$0xff] }
  0x21   : > { %1211 = vmatpush3.bf16.msra.mxu0 %v1210_v58  ;;  %1169 = vmatprep.subr.bf16.mxu1 %v1168_v62 }
  0xee   : > { %v1119_v18 = vpop.f32.mrb[0].mxu1 }
  0xef   : > { %v435_v19 = vadd.f32 %v1119_v18, %v997_v17  ;;  %v429_v20 = vpop.f32.mrb[1].mxu1  ;;  %v627_v18 = vld [vmem:[%s1813_s5 + $0xc0] sm:$0xff] }
  0xf0   : > { %v430_v21 = vadd.f32 %v997_v17, %v429_v20 }
  0xf1   : > { %v449_v22 = vmax.f32 %v435_v19, 0.0  ;;  %v628_v19 = vld [vmem:[%s1813_s5 + $0xc8] sm:$0xff] }
  0xf2   : > { %v448_v23 = vmax.f32 %v430_v21, 0.0  ;;  %v1122_v24 = vpop.f32.mrb[2].mxu1  ;;  %v1184_v21 = vpack.c.bf16 %v628_v19, %v627_v18  ;;  %v812_v18 = vld [vmem:[%s1815_s7 + $0x28] sm:$0xff]  ;;  %v829_v19 = vld [vmem:[%s1815_s7 + $0xb0] sm:$0xff] }
  0xf3   : > { %v439_v25 = vpop.f32.mrb[3].mxu1  ;;  %v456_v26 = vrot.slane %v449_v22, 4  ;;  %v445_v36 = vadd.f32 %v1122_v24, %v997_v17  ;;  %v629_v24 = vld [vmem:[%s1813_s5 + $0xd0] sm:$0xff] }
  0xf4   : > { %v455_v27 = vrot.slane %v448_v23, 4  ;;  %v440_v28 = vadd.f32 %v997_v17, %v439_v25  ;;  %v610_v17 = vld [vmem:[%s1813_s5 + $0x38] sm:$0xff] }
  0xf5   : > { %v451_v37 = vmax.f32 %v445_v36, 0.0  ;;  %v630_v25 = vld [vmem:[%s1813_s5 + $0xd8] sm:$0xff] }
  0xf6   : > { %v450_v29 = vmax.f32 %v440_v28, 0.0  ;;  %v457_v30 = vsel %vm359_vm1, %v455_v27, %v456_v26  ;;  %v1188_v27 = vpack.c.bf16 %v630_v25, %v629_v24  ;;  %v613_v28 = vld [vmem:[%s1813_s5 + $0x50] sm:$0xff]  ;;  %v814_v24 = vld [vmem:[%s1815_s7 + $0x38] sm:$0xff]  ;;  %v831_v25 = vld [vmem:[%s1815_s7 + $0xc0] sm:$0xff] }
  0xf7   : > { %460 = vrot.lane.b32.xlu0 %v457_v30, %s1370_s17  ;;  %v631_v30 = vld [vmem:[%s1813_s5 + $0xe0] sm:$0xff] }
  0xf8   : > { %v458_v33 = vrot.slane %v450_v29, 4 }
  0xfa   : > { %v459_v35 = vsel %vm359_vm1, %v456_v26, %v458_v33 }
  0xfb   : > { %462 = vrot.lane.b32.xlu1 %v459_v35, %s1370_s17  ;;  %470 = vrot.lane.b32.xlu0 %v449_v22, %s1371_s25  ;;  %v616_v35 = vld [vmem:[%s1813_s5 + $0x68] sm:$0xff] }
  0xfc   : > { %v1194_v36 = vpack.c.bf16 %v616_v35, %v615_v34  ;;  %v817_v35 = vld [vmem:[%s1815_s7 + $0x50] sm:$0xff] }
  0xff   : > { %472 = vrot.lane.b32.xlu1 %v450_v29, %s1371_s25  ;;  %464 = vrot.lane.b32.xlu0 %v458_v33, %s1370_s17  ;;  %v1192_v33 = vpack.c.bf16 %v632_v31, %v631_v30  ;;  %s1372_s17 = smov 64   ;;  %v816_v30 = vld [vmem:[%s1815_s7 + $0x48] sm:$0xff]  ;;  %v833_v31 = vld [vmem:[%s1815_s7 + $0xd0] sm:$0xff] }
 0x103   : > { %474 = vrot.lane.b32.xlu1 %v451_v37, %s1371_s25  ;;  %v633_v37 = vld [vmem:[%s1813_s5 + $0xf0] sm:$0xff] }
 0x169   : > { %v461_v38 = vpop.permute.xlu0 %460 }
 0x16a   : > { %v480_v39 = vsel %vm479_vm3, %v448_v23, %v461_v38  ;;  %v612_v23 = vld [vmem:[%s1813_s5 + $0x48] sm:$0xff]  ;;  %v634_v38 = vld [vmem:[%s1813_s5 + $0xf8] sm:$0xff] }
 0x16d   : > { %v463_v40 = vpop.permute.xlu1 %462  ;;  %v471_v41 = vpop.permute.xlu0 %470 }
 0x16e   : > { %v484_v42 = vsel %vm483_vm4, %v480_v39, %v471_v41  ;;  %v481_v43 = vsel %vm479_vm3, %v449_v22, %v463_v40  ;;  %v611_v22 = vld [vmem:[%s1813_s5 + $0x40] sm:$0xff]  ;;  %v1196_v40 = vpack.c.bf16 %v634_v38, %v633_v37  ;;  %v617_v41 = vld [vmem:[%s1813_s5 + $0x70] sm:$0xff]  ;;  %v836_v38 = vld [vmem:[%s1815_s7 + $0xe8] sm:$0xff] }
 0x16f   : > { %1130 = vmatmul.mubr.msk.f32.vlgmr.msra.gmra.mrb[4].mxu1 %vm497_vm5, %v484_v42  ;;  %v1186_v26 = vpack.c.bf16 %v612_v23, %v611_v22  ;;  %v1003_v39 = vld [vmem:[%s1812_s4] ss:$0 sm:$0xff]  ;;  %v618_v42 = vld [vmem:[%s1813_s5 + $0x78] sm:$0xff]  ;;  %v813_v23 = vld [vmem:[%s1815_s7 + $0x30] sm:$0xff] }
 0x170   : > { %1132 = vmatprep.mubr.msk.f32.mxu1 %vm1369_vm2, %v1368_v16  ;;  %1171 = vmatpush3.bf16.msra.mxu1 %v1170_v2  ;;  %v823_v2 = vld [vmem:[%s1815_s7 + $0x80] sm:$0xff] }
 0x171   : > { %v473_v44 = vpop.permute.xlu1 %472  ;;  %v465_v46 = vpop.permute.xlu0 %464  ;;  %1173 = vmatprep.subr.bf16.mxu1 %v1172_v3  ;;  %v824_v3 = vld [vmem:[%s1815_s7 + $0x88] sm:$0xff]  ;;  %v835_v37 = vld [vmem:[%s1815_s7 + $0xe0] sm:$0xff] }
 0x172   : > { %v485_v45 = vsel %vm483_vm4, %v481_v43, %v473_v44  ;;  %v482_v47 = vsel %vm479_vm3, %v450_v29, %v465_v46  ;;  %v614_v29 = vld [vmem:[%s1813_s5 + $0x58] sm:$0xff]  ;;  %v1198_v43 = vpack.c.bf16 %v618_v42, %v617_v41  ;;  %v1212_v5 = vpack.c.bf16 %v824_v3, %v823_v2  ;;  %v819_v41 = vld [vmem:[%s1815_s7 + $0x60] sm:$0xff]  ;;  %v820_v42 = vld [vmem:[%s1815_s7 + $0x68] sm:$0xff] }
 0x173   : > { %1133 = vmatmul.mubr.msk.f32.gmra.mrb[6].mxu1 %vm497_vm5, %v485_v45  ;;  %v1190_v32 = vpack.c.bf16 %v614_v29, %v613_v28  ;;  %v815_v29 = vld [vmem:[%s1815_s7 + $0x40] sm:$0xff] }
 0x174   : > { %1135 = vmatprep.mubr.msk.f32.mxu1 %vm1369_vm2, %v1368_v16  ;;  %1175 = vmatpush3.bf16.msra.mxu1 %v1174_v8  ;;  %v609_v16 = vld [vmem:[%s1813_s5 + $0x30] sm:$0xff]  ;;  %v826_v8 = vld [vmem:[%s1815_s7 + $0x98] sm:$0xff] }
 0x175   : > { %v475_v48 = vpop.permute.xlu1 %474  ;;  %1177 = vmatprep.subr.bf16.mxu1 %v1176_v9  ;;  %v1182_v20 = vpack.c.bf16 %v610_v17, %v609_v16  ;;  %v1214_v9 = vpack.c.bf16 %v808_v6, %v807_v4  ;;  %v1216_v10 = vpack.c.bf16 %v826_v8, %v825_v7  ;;  %1213 = vmatprep.subr.bf16.mxu0 %v1212_v5  ;;  %v811_v17 = vld [vmem:[%s1815_s7 + $0x20] sm:$0xff] }
 0x176   : > { %v486_v49 = vsel %vm483_vm4, %v482_v47, %v475_v48 }
 0x177   : > { %1136 = vmatmul.mubr.msk.f32.gmra.mrb[8].mxu1 %vm497_vm5, %v486_v49 }
 0x178   : > { %1179 = vmatpush3.bf16.msra.mxu1 %v1178_v14  ;;  %v828_v14 = vld [vmem:[%s1815_s7 + $0xa8] sm:$0xff] }
 0x179   : > { %1181 = vmatprep.subr.bf16.mxu1 %v1180_v15  ;;  %v1218_v15 = vpack.c.bf16 %v810_v12, %v809_v11  ;;  %v1220_v16 = vpack.c.bf16 %v828_v14, %v827_v13 }
 0x17c   : > { %1183 = vmatpush3.bf16.msra.mxu1 %v1182_v20  ;;  %v830_v20 = vld [vmem:[%s1815_s7 + $0xb8] sm:$0xff] }
 0x17d   : > { %1185 = vmatprep.subr.bf16.mxu1 %v1184_v21  ;;  %v1222_v21 = vpack.c.bf16 %v812_v18, %v811_v17  ;;  %v1224_v22 = vpack.c.bf16 %v830_v20, %v829_v19 }
 0x180   : > { %1187 = vmatpush3.bf16.msra.mxu1 %v1186_v26  ;;  %v832_v26 = vld [vmem:[%s1815_s7 + $0xc8] sm:$0xff] }
 0x181   : > { %1189 = vmatprep.subr.bf16.mxu1 %v1188_v27  ;;  %v1226_v27 = vpack.c.bf16 %v814_v24, %v813_v23  ;;  %v1228_v28 = vpack.c.bf16 %v832_v26, %v831_v25 }
 0x184   : > { %1191 = vmatpush3.bf16.msra.mxu1 %v1190_v32  ;;  %v834_v32 = vld [vmem:[%s1815_s7 + $0xd8] sm:$0xff] }
 0x185   : > { %1193 = vmatprep.subr.bf16.mxu1 %v1192_v33  ;;  %v1230_v33 = vpack.c.bf16 %v816_v30, %v815_v29  ;;  %v1232_v34 = vpack.c.bf16 %v834_v32, %v833_v31 }
 0x188   : > { %1195 = vmatpush3.bf16.msra.mxu1 %v1194_v36  ;;  %v818_v36 = vld [vmem:[%s1815_s7 + $0x58] sm:$0xff] }
 0x189   : > { %1197 = vmatprep.subr.bf16.mxu1 %v1196_v40  ;;  %v1236_v40 = vpack.c.bf16 %v836_v38, %v835_v37 }
 0x18c   : > { %1199 = vmatpush3.bf16.msra.mxu1 %v1198_v43  ;;  %v1238_v43 = vpack.c.bf16 %v820_v42, %v819_v41 }
 0x242   : > { %v573_v44 = vpop.f32.mrb[4].mxu1 }
 0x243   : > { %v574_v45 = vadd.f32 %v1003_v39, %v573_v44  ;;  %v1131_v46 = vpop.f32.mrb[5].mxu1  ;;  %v837_v44 = vld [vmem:[%s1815_s7 + $0xf0] sm:$0xff] }
 0x245   : > { %v587_v48 = vmax.f32 %v574_v45, 0.0  ;;  %v838_v45 = vld [vmem:[%s1815_s7 + $0xf8] sm:$0xff] }
 0x246   : > { %v578_v47 = vpop.f32.mrb[6].mxu1  ;;  %v1240_v46 = vpack.c.bf16 %v838_v45, %v837_v44 }
 0x247   : > { %v579_v49 = vadd.f32 %v1003_v39, %v578_v47  ;;  %v1134_v50 = vpop.f32.mrb[7].mxu1  ;;  %v591_v53 = vrot.slane %v587_v48, 4  ;;  %v821_v47 = vld [vmem:[%s1815_s7 + $0x70] sm:$0xff] }
 0x249   : > { %v588_v51 = vmax.f32 %v579_v49, 0.0 }
 0x24a   : > { %v583_v52 = vpop.f32.mrb[8].mxu1 }
 0x24b   : > { %v596_v54 = vrot.slane %v588_v51, 4  ;;  %v584_v55 = vadd.f32 %v1003_v39, %v583_v52  ;;  %v1137_v56 = vpop.f32.mrb[9].mxu1  ;;  %v1234_v39 = vpack.c.bf16 %v818_v36, %v817_v35 }
 0x24d   : > { %v589_v57 = vmax.f32 %v584_v55, 0.0  ;;  %v1289_v58 = vpack.i.bf16 %v591_v53, %v596_v54 }
 0x24f   : > { %1290 = vrot.lane.b32.xlu0 %v1289_v58, %s1372_s17  ;;  %1155 = vmatmul.mubr.msk.f32.vlgmr.msra.gmra.mrb[0].mxu0 %vm600_vm6, %v589_v57 }
 0x250   : > { %1215 = vmatpush3.bf16.msra.mxu0 %v1214_v9 }
 0x251   : > { %1217 = vmatprep.subr.bf16.mxu0 %v1216_v10 }
 0x254   : > { %1219 = vmatpush3.bf16.msra.mxu0 %v1218_v15 }
 0x255   : > { %1221 = vmatprep.subr.bf16.mxu0 %v1220_v16 }
 0x258   : > { %1223 = vmatpush3.bf16.msra.mxu0 %v1222_v21 }
 0x259   : > { %1225 = vmatprep.subr.bf16.mxu0 %v1224_v22 }
 0x25c   : > { %1227 = vmatpush3.bf16.msra.mxu0 %v1226_v27 }
 0x25d   : > { %1229 = vmatprep.subr.bf16.mxu0 %v1228_v28 }
 0x260   : > { %1231 = vmatpush3.bf16.msra.mxu0 %v1230_v33 }
 0x261   : > { %1233 = vmatprep.subr.bf16.mxu0 %v1232_v34 }
 0x264   : > { %1235 = vmatpush3.bf16.msra.mxu0 %v1234_v39 }
 0x265   : > { %1237 = vmatprep.subr.bf16.mxu0 %v1236_v40 }
 0x268   : > { %1239 = vmatpush3.bf16.msra.mxu0 %v1238_v43 }
 0x269   : > { %1241 = vmatprep.subr.bf16.mxu0 %v1240_v46 }
 0x2c1   : > { %v1291_v59 = vpop.permute.xlu0 %1290 }
 0x2c2   : > { %v1293_v60 = vunpack.i.h.bf16 %v1291_v59  ;;  %v1292_v61 = vunpack.i.l.bf16 %v1291_v59 }
 0x2c4   : > { %v602_v62 = vsel %vm600_vm6, %v588_v51, %v1292_v61  ;;  %v601_v63 = vsel %vm600_vm6, %v587_v48, %v1293_v60  ;;  %v822_v48 = vld [vmem:[%s1815_s7 + $0x78] sm:$0xff]  ;;  %v1007_v51 = vld [vmem:[%s1814_s6] ss:$0 sm:$0xff] }
 0x2c5   : > { %717 = vmatprep.mubr.f32.mxu1 %v602_v62  ;;  %v1242_v50 = vpack.c.bf16 %v822_v48, %v821_v47 }
 0x2c6   : > { %718 = vmatmul.mubr.f32.vlgmr.msra.gmra.mrb[10].mxu1 %v601_v63 }
 0x2c7   : > { %1243 = vmatpush3.bf16.msra.mxu0 %v1242_v50 }
 0x322   : > { %v1650_v0 = vpop.f32.mrb[0].mxu0 }
 0x323   : > { %v1156_v1 = vpop.f32.mrb[1].mxu0 }
 0x399   : > { %v1060_v49 = vpop.f32.mrb[10].mxu1 }
 0x39a   : > { %v1061_v52 = vpop.f32.mrb[11].mxu1 }
 0x39b   : > { %v1062_v53 = vadd.f32 %v1061_v52, %v1060_v49 }
 0x39d   : > { %v720_v54 = vadd.f32 %v1062_v53, %v1007_v51 }
 0x39f   : > { %v790_v55 = vadd.f32 %v1650_v0, %v720_v54  ;;  %v839_v0 = vld [vmem:[%s1816_s8] sm:$0x1] }
 0x3a1   : > { %v793_v56 = vmax.f32 %v790_v55, 0.0 }
 0x3a3   : > { %v795_v57 = vrot.slane %v793_v56, 1  ;;  %v801_v58 = vrot.slane %v793_v56, 3  ;;  %v799_v63 = vrot.slane %v793_v56, 2 }
 0x3a5   : > { %v1294_v59 = vpack.i.bf16 %v795_v57, %v801_v58 }
 0x3a7   : > { %1295 = vrot.lane.b32.xlu1 %v1294_v59, %s1372_s17  ;;  %s323_s17 = sand.u32 1, %s1357_s10  }
 0x3a8   : > { %s324_s24 = scalar_lea.vmem [#allocation2], %s323_s17  ;;  %s924_s29 = scalar_lea.sflag [#allocation3], %s323_s17 }
 0x3a9   : > { %s936_s25 = sshll.u32 %s324_s24, 4  ;;  %s1767_s25 = int_to_ptr.vmem [resolvable:$true] %s936_s25 }
 0x3aa   : > { %s1303_s14 = scalar_lea.vmem %s1767_s25, 16  ;;  %p1310_p0 = scmp.lt.s32.totalorder %s1767_s25, %s1308_s16 }
 0x3ab   : > { %p1304_p11 = scmp.ne.s32.totalorder %s1767_s25, %s1303_s14  ;;  %p1311_p1 = scmp.lt.s32.totalorder %s1309_s21, %s1303_s14 }
 0x3ad   : > { %p1305_p12 = pnand %p1304_p11, %p1462_p5  ;;  %p1312_p2 = por %p1311_p1, %p1310_p0 }
 0x3af   : > { %p1306_p13 = pneg %p1305_p12 }
 0x3b1   : > { %p1313_p3 = pnand %p1312_p2, %p1306_p13 }
 0x419   : > { %v1296_v60 = vpop.permute.xlu1 %1295 }
 0x41a   : > { %v1298_v61 = vunpack.i.h.bf16 %v1296_v60  ;;  %v1297_v62 = vunpack.i.l.bf16 %v1296_v60 }
 0x41c   : > { %v806_v1 = vsel %vm600_vm6, %v799_v63, %v1297_v62  ;;  %v805_v2 = vsel %vm600_vm6, %v793_v56, %v1298_v61 }
 0x41d   : > { %904 = vmatprep.mubr.f32.mxu0 %v806_v1 }
 0x41e   : > { %905 = vmatmul.mubr.f32.vlgmr.msra.gmra.mrb[2].mxu0 %v805_v2 }
 0x4f1   : > { %v1104_v3 = vpop.f32.mrb[2].mxu0 }
 0x4f2   : > { %v1105_v4 = vpop.f32.mrb[3].mxu0 }
 0x4f3   : > { %v1106_v5 = vadd.f32 %v1105_v4, %v1104_v3 }
 0x4f5   : > { %v907_v6 = vadd.f32 %v1106_v5, %v839_v0 }
 0x4f7   : > { %v911_v7 = vsel %vm910_vm7, %v907_v6, -inf }
 0x4f8   : > { %912 = vmax.xlane.f32.xlu0 %v911_v7 }
 0x585   : > { %v913_v8 = vpop.xlane.xlu0 %912 }
 0x586   : > { %v914_v9 = vsub.f32 %v907_v6, %v913_v8 }
 0x588   : > { %v915_v10 = vmul.f32 1.442695, %v914_v9 }
 0x58a   : > { %1299 = vpow2.f32 %v915_v10 }
 0x594   : > { %v1300_v11 = vpop.eup %1299 }
 0x595   : > { %v917_v12 = vsel %vm910_vm7, %v1300_v11, 0.0 }
 0x596   : > { %918 = vadd.xlane.f32.xlu1 %v917_v12 }
 0x623   : > { %v919_v13 = vpop.xlane.xlu1 %918 }
 0x624   : > { %1301 = vrcp.f32 %v919_v13 }
 0x62e   : > { %v1302_v14 = vpop.eup %1301 }
 0x62f   : > { %v921_v15 = vmul.f32 %v1302_v14, %v1300_v11 }
 0x631   : > { %922 = vst.msk [vmem:[%s324_s24] sm:$0x1] %vm910_vm7, %v921_v15 }
 0x632   : > { %1316 = shalt.err (!%p1313_p3)
}
 0x633   : > { %s1317_s22 = scalar_lea.hbm %s1765_s28, 16  ;;  %s1321_s24 = scalar_lea.hbm %s1817_s9, 32 }
 0x634   : > { %p1318_p4 = scmp.ne.s32.totalorder %s1765_s28, %s1317_s22  ;;  %p1322_p9 = scmp.lt.u32.totalorder %s1765_s28, %s1817_s9 }
 0x635   : > { %p1323_p10 = scmp.lt.u32.totalorder %s1321_s24, %s1317_s22  ;;  %p1325_p12 = scmp.lt.u32.totalorder %s1317_s22, %s1765_s28 }
 0x636   : > { %p1319_p7 = pnand %p1318_p4, %p1462_p5 }
 0x637   : > { %p1324_p11 = por %p1323_p10, %p1322_p9 }
 0x638   : > { %p1320_p8 = pneg %p1319_p7 }
 0x639   : > { %p1326_p13 = por %p1325_p12, %p1324_p11 }
 0x63b   : > { %p1327_p0 = pnand %p1326_p13, %p1320_p8 }
 0x63d   : > { %1330 = shalt.err (!%p1327_p0)
}
 0x63e   : > { %1244 = dma.vmem_to_hbm [thread:$0]  (%p1462_p5), %s1767_s25, 16, %s1765_s28, %s924_s29  }
 0x63f PF: > { %p1250_p1 = scmp.ge.s32.totalorder %s1365_s12, 2  ;;  %s948_s14 = sand.u32 1, %s1353_s30  }
 0x640   : > { %s949_s13 = scalar_lea.sflag [#allocation3], %s948_s14 }
 0x641   : > { %p1247_p2 = pnand %p1250_p1, %p1466_p6 }
 0x643   : > { %1348 = dma.done.wait (!%p1247_p2), %s949_s13, 16  }
 0x644   : > { %1350 = vsyncadd (!%p1247_p2), %s949_s13, 4294967280  ;;  %p19_p3 = scmp.ge.s32.totalorder %s1449_s15, 4   ;;  %s1820_s30 = smov %s1357_s10 }
 0x645   : > { %s1821_s10 = smov %s1361_s11  ;;  %s1822_s11 = smov %s1460_s18 }
 0x646   : > { %s1823_s12 = smov %s1449_s15  ;;  %21 = sbr.rel (!%p19_p3) target bundleno = 3 (0x3), region = 91 }
 0x64d   :  { %953 = vsyncpa [#allocation3], 1 }
 0x64e   :  { %955 = vsyncpa [#allocation3 + $0x1], 1 }

</bundles_post_ra>
